<compile_context>
chip_gen: v7x
topology: tpu7x:2x2x1
jax: 0.10.0
libtpu: 0.0.40
codegen_flags: <defaults>
</compile_context>

<pallas_src>
import functools

import jax
import jax.numpy as jnp
import numpy as np
from jax import lax
from jax.experimental import pallas as pl
from jax.experimental.pallas import tpu as pltpu


def _bvq_kernel(h, d, m_pad, use_bf16, *refs):
    """One grid step = one (batch, token-tile) pair.

    refs (use_bf16=False):
      x_ref:      (1, n_tile, h*d)       incoming vectors (natural layout)
      bd_ref:     (h*d, h*m_pad)   f32   block-diagonal codebook
      c2_ref:     (1, h*m_pad)     f32   0.5*||c||^2 (+1e30 on padded codes)
      out_ref:    (1, n_tile, h*d)       quantized output (lane-dense store)
      idx_ref:    (1, n_tile, h)   i32   chosen codebook indices
      counts_ref: (1, 1, h, m_pad) f32   per-(b, n_block) one-hot counts
      loss_ref:   (1, 1, 1, 1)     f32   per-(b, n_block) sum of squared errors
    With use_bf16=True an extra bd16_ref (bf16 copy of bd) follows bd_ref.
    """
    if use_bf16:
        (x_ref, bd_ref, bd16_ref, c2_ref,
         out_ref, idx_ref, counts_ref, loss_ref) = refs
    else:
        (x_ref, bd_ref, c2_ref,
         out_ref, idx_ref, counts_ref, loss_ref) = refs
        bd16_ref = None

    n_tile = x_ref.shape[1]

    x = x_ref[0].astype(jnp.float32)                        # (n_tile, h*d)

    # ---- fused distance matmul: all heads in one MXU op (K = h*d) ----------
    if use_bf16:
        cross = lax.dot_general(
            x.astype(jnp.bfloat16), bd16_ref[...],
            (((1,), (0,)), ((), ())),
            preferred_element_type=jnp.float32)             # (n_tile, h*m_pad)
    else:
        cross = lax.dot_general(
            x, bd_ref[...],
            (((1,), (0,)), ((), ())),
            preferred_element_type=jnp.float32)             # (n_tile, h*m_pad)

    # argmax(q.c - 0.5||c||^2) == nearest code; padded codes carry -1e30.
    score = cross - c2_ref[...]                             # (n_tile, h*m_pad)

    iota_m = lax.broadcasted_iota(jnp.int32, (n_tile, m_pad), 1)
    lane_h = lax.broadcasted_iota(jnp.int32, (n_tile, h), 1)
    sub_h = lax.broadcasted_iota(jnp.int32, (h, m_pad), 0)

    idx_all = jnp.zeros((n_tile, h), jnp.int32)
    counts_all = jnp.zeros((h, m_pad), jnp.float32)
    onehots = []
    # h is small -> static unroll; each per-head slab is a lane-aligned view of
    # score (m_pad is a multiple of 128).
    for hh in range(h):
        s_h = score[:, hh * m_pad:(hh + 1) * m_pad]          # (n_tile, m_pad)
        # NOTE: jnp.argmax(s_h, -1) would save one XLU reduce per head; kept as
        # the proven max/where/min sequence (same first-index tie-breaking).
        smax = jnp.max(s_h, axis=-1, keepdims=True)          # (n_tile, 1)
        idx = jnp.min(jnp.where(s_h >= smax, iota_m, m_pad),
                      axis=-1, keepdims=True)                # (n_tile, 1)
        onehot = (iota_m == idx).astype(jnp.float32)         # (n_tile, m_pad)
        onehots.append(onehot)
        # assemble lane-dense index / count slabs (single store per step below)
        idx_all = jnp.where(lane_h == hh, idx, idx_all)
        counts_all = jnp.where(sub_h == hh,
                               jnp.sum(onehot, axis=0, keepdims=True),
                               counts_all)

    # ---- fused reconstruction: one matmul, one lane-dense store -------------
    onehot_full = jnp.concatenate(onehots, axis=-1)          # (n_tile, h*m_pad)
    out = lax.dot_general(onehot_full, bd_ref[...],
                          (((1,), (1,)), ((), ())),
                          preferred_element_type=jnp.float32)  # (n_tile, h*d)

    out_ref[0] = out.astype(out_ref.dtype)
    idx_ref[0] = idx_all
    counts_ref[0, 0] = counts_all
    diff = x - out
    loss_ref[...] = jnp.sum(diff * diff).reshape(1, 1, 1, 1)


def _vmem_capacity_bytes(default=64 * 1024 * 1024):
    try:
        info = pltpu.get_tpu_info()
        return int(getattr(info, "vmem_capacity_bytes", default))
    except Exception:  # pragma: no cover - conservative fallback
        return default


def _pick_n_tile(n, features, h, m_pad, hd, hm, itemsize, use_bf16, budget):
    """Largest token tile whose resident VMEM fits in `budget` bytes."""
    # Constant (per-call) buffers.  The constant-index-map BlockSpecs are still
    # double-buffered by the default pipeline; account for 2x.
    # TODO(synk): pipeline_mode=pl.Buffered(1) on the codebook specs would halve
    # this once single-buffered constant inputs are exercised on this toolchain.
    fixed = 2 * hd * hm * 4 + 2 * hm * 4 + 2 * h * m_pad * 4
    if use_bf16:
        fixed += 2 * hd * hm * 2

    def step_bytes(nt):
        return (4 * nt * features * itemsize        # x + out tiles (2-buffered)
                + 2 * nt * h * 4                    # idx tile
                + 3 * nt * hm * 4                   # score / onehot temporaries
                + 2 * nt * hd * 4)                  # f32 x / out temporaries

    divisors = [c for c in (2048, 1024, 512, 256, 128, 64, 32, 16, 8)
                if n % c == 0]
    for cand in divisors:
        if fixed + step_bytes(cand) <= budget:
            return cand
    if divisors:
        return divisors[-1]
    # TODO(synk): pad/mask the token axis when n has no multiple-of-8 divisor
    # that fits VMEM; a single whole-n tile is used as a last resort.
    return n


def bvq_forward(x, codebooks, budget_ema, expire_threshold=0.05,
                n_tile=None, use_bf16_distance=False):
    """Eval-mode BVQ.forward.  x: (b, n, features), codebooks: (h, m, d).

    use_bf16_distance=True is recommended on v6e/v7x (bf16-native MXU) but can
    flip the argmax for near-tied codes; default False for exact f32 indices.
    """
    b, n, features = x.shape
    h, m, d = codebooks.shape
    assert features == h * d, "features must equal num_heads * head_features"

    # ---- constant preprocessing (once per call; tiny vs. the activations) ----
    m_pad = ((m + 127) // 128) * 128                 # lane-pad the codebook axis
    hd, hm = h * d, h * m_pad

    c_pad = jnp.pad(codebooks.astype(jnp.float32),
                    ((0, 0), (0, m_pad - m), (0, 0)))            # (h, m_pad, d)
    # Block-diagonal codebook: bd[hh*d+dd, hh*m_pad+mm] = c_pad[hh, mm, dd].
    # NOTE: this is h x larger than the raw codebook; fine for typical BVQ
    # sizes, re-check against the v7x 64 MiB VMEM budget for very large h*m*d.
    eye = jnp.eye(h, dtype=jnp.float32)
    bd = jnp.einsum("hg,hmd->hdgm", eye, c_pad).reshape(hd, hm)  # (h*d, h*m_pad)
    pad_pen = jnp.where(jnp.arange(m_pad) < m, 0.0, 1e30).astype(jnp.float32)
    c2 = (0.5 * jnp.sum(c_pad * c_pad, axis=-1)
          + pad_pen[None, :]).reshape(1, hm)                     # (1, h*m_pad)

    # ---- VMEM-aware token tile (v7x: 64 MiB physical; v5e/v6e: 128 MiB) -----
    vmem_cap = _vmem_capacity_bytes()
    vmem_limit = min(int(vmem_cap * 3 // 4), 112 * 1024 * 1024)
    if n_tile is None:
        n_tile = _pick_n_tile(n, features, h, m_pad, hd, hm,
                              x.dtype.itemsize, use_bf16_distance,
                              int(vmem_limit * 0.7))
    assert n % n_tile == 0
    n_blocks = n // n_tile

    kernel = functools.partial(_bvq_kernel, h, d, m_pad, use_bf16_distance)

    in_arrays = [x, bd]
    in_specs = [
        pl.BlockSpec((1, n_tile, features), lambda bi, ni: (bi, ni, 0)),
        pl.BlockSpec((hd, hm), lambda bi, ni: (0, 0)),
    ]
    if use_bf16_distance:
        # bf16 cast hoisted out of the kernel (distance matmul only).
        in_arrays.append(bd.astype(jnp.bfloat16))
        in_specs.append(pl.BlockSpec((hd, hm), lambda bi, ni: (0, 0)))
    in_arrays.append(c2)
    in_specs.append(pl.BlockSpec((1, hm), lambda bi, ni: (0, 0)))

    out_shapes = (
        jax.ShapeDtypeStruct((b, n, features), x.dtype),       # quantized out
        jax.ShapeDtypeStruct((b, n, h), jnp.int32),             # indices
        jax.ShapeDtypeStruct((b, n_blocks, h, m_pad), jnp.float32),  # counts
        jax.ShapeDtypeStruct((b, n_blocks, 1, 1), jnp.float32),      # sq. err.
    )
    out_specs = [
        pl.BlockSpec((1, n_tile, features), lambda bi, ni: (bi, ni, 0)),
        pl.BlockSpec((1, n_tile, h), lambda bi, ni: (bi, ni, 0)),
        pl.BlockSpec((1, 1, h, m_pad), lambda bi, ni: (bi, ni, 0, 0)),
        pl.BlockSpec((1, 1, 1, 1), lambda bi, ni: (bi, ni, 0, 0)),
    ]

    grid_spec = pltpu.PrefetchScalarGridSpec(
        num_scalar_prefetch=0,
        grid=(b, n_blocks),
        in_specs=in_specs,
        out_specs=out_specs,
    )

    out, idx_bnh, counts, loss_sum = pl.pallas_call(
        kernel,
        out_shape=out_shapes,
        grid_spec=grid_spec,
        compiler_params=pltpu.CompilerParams(
            # no cross-step accumulators -> both grid axes fully parallel
            # (v7x 2-TC megacore even when b == 1).
            dimension_semantics=("parallel", "parallel"),
            vmem_limit_bytes=int(vmem_limit),
        ),
    )(*in_arrays)

    # ---- info dict (tiny tensors; plain JAX glue) ----
    loss = jnp.sum(loss_sum) / jnp.float32(b * n * features)          # mse_loss
    counts_hm = jnp.sum(counts, axis=(0, 1))[:, :m]                   # (h, m)
    mean = counts_hm / jnp.float32(b * n)
    perp = jnp.exp(-jnp.sum(mean * jnp.log(mean + 1e-10), axis=-1))   # (h,)
    # eval mode -> expire_dead_codes only returns the per-head expired counts
    replaced_codes = jnp.sum(
        (budget_ema < expire_threshold).astype(jnp.int32), axis=-1)   # (h,)

    info = {
        "indices": jnp.transpose(idx_bnh, (0, 2, 1)),  # (b, h, n); torch: int64
        "loss": loss,
        "perplexity": perp,
        "replaced_codes": replaced_codes,
        "budget": budget_ema,
    }
    return out, info


def _bvq_reference(x, codebooks):
    """Pure-JAX reference of the eval forward, for a sanity check."""
    b, n, features = x.shape
    h, m, d = codebooks.shape
    q = x.reshape(b, n, h, d).transpose(0, 2, 1, 3)                   # (b,h,n,d)
    c = jnp.broadcast_to(codebooks[None], (b, h, m, d))
    dist = jnp.sqrt(jnp.maximum(
        jnp.sum(q * q, -1, keepdims=True)
        - 2.0 * jnp.einsum("bhnd,bhmd->bhnm", q, c)
        + jnp.sum(c * c, -1)[:, :, None, :], 0.0))
    idx = jnp.argmax(-dist, axis=-1)                                  # (b,h,n)
    attn = jax.nn.one_hot(idx, m, dtype=jnp.float32)
    out = jnp.einsum("bhnm,bhmd->bhnd", attn, c)
    out = out.transpose(0, 2, 1, 3).reshape(b, n, features)
    loss = jnp.mean((x - out) ** 2)
    mean = jnp.mean(attn, axis=(0, 2))                                # (h, m)
    perp = jnp.exp(-jnp.sum(mean * jnp.log(mean + 1e-10), axis=-1))
    return out, idx, loss, perp


if __name__ == "__main__":
    key = jax.random.PRNGKey(0)
    batch, seq, features = 2, 8, 32
    num_heads, codebook_size = 4, 16
    head_features = features // num_heads

    kx, kc = jax.random.split(key)
    x = jax.random.normal(kx, (batch, seq, features), dtype=jnp.float32)
    # deterministic parameter init (matches torch.randn shapes in __init__)
    codebooks = jax.random.normal(
        kc, (num_heads, codebook_size, head_features), dtype=jnp.float32)
    budget_ema = jnp.ones((num_heads, codebook_size), dtype=jnp.float32)

    out, info = bvq_forward(x, codebooks, budget_ema)
    jax.block_until_ready(out)
    jax.block_until_ready(info["loss"])

    # sanity check against pure-JAX reference
    ref_out, ref_idx, ref_loss, ref_perp = _bvq_reference(x, codebooks)
    np.testing.assert_allclose(np.asarray(out), np.asarray(ref_out),
                               rtol=1e-5, atol=1e-5)
    np.testing.assert_array_equal(np.asarray(info["indices"]),
                                  np.asarray(ref_idx))
    np.testing.assert_allclose(float(info["loss"]), float(ref_loss),
                               rtol=1e-5, atol=1e-6)
    np.testing.assert_allclose(np.asarray(info["perplexity"]),
                               np.asarray(ref_perp), rtol=1e-5, atol=1e-5)

    print("KERNEL_OK")
</pallas_src>

<mosaic_0001>
module attributes {stable_mosaic.version = 11 : i64} {
  func.func @_bvq_kernel(%arg0: i32, %arg1: i32, %arg2: memref<1x8x32xf32, #tpu.memory_space<vmem>>, %arg3: memref<32x512xf32, #tpu.memory_space<vmem>>, %arg4: memref<1x512xf32, #tpu.memory_space<vmem>>, %arg5: memref<1x8x32xf32, #tpu.memory_space<vmem>>, %arg6: memref<1x8x4xi32, #tpu.memory_space<vmem>>, %arg7: memref<1x1x4x128xf32, #tpu.memory_space<vmem>>, %arg8: memref<1x1x1x1xf32, #tpu.memory_space<vmem>>) attributes {dimension_semantics = [#tpu.dimension_semantics<parallel>, #tpu.dimension_semantics<parallel>], iteration_bounds = array<i64: 2, 1>, scalar_prefetch = 0 : i64, scratch_operands = 0 : i64, tpu.core_type = #tpu.core_type<tc>, window_params = [{transform_indices = @transform_0, window_bounds = array<i64: 1, 8, 32>}, {pipeline_mode = #tpu.pipeline_mode<synchronous>, transform_indices = @transform_1, window_bounds = array<i64: 32, 512>}, {pipeline_mode = #tpu.pipeline_mode<synchronous>, transform_indices = @transform_2, window_bounds = array<i64: 1, 512>}, {transform_indices = @transform_3, window_bounds = array<i64: 1, 8, 32>}, {transform_indices = @transform_4, window_bounds = array<i64: 1, 8, 4>}, {transform_indices = @transform_5, window_bounds = array<i64: 1, 1, 4, 128>}, {transform_indices = @transform_6, window_bounds = array<i64: 1, 1, 1, 1>}]} {
    %c0 = arith.constant 0 : index
    %c0_0 = arith.constant 0 : index
    %c0_1 = arith.constant 0 : index
    %0 = vector.load %arg2[%c0, %c0_0, %c0_1] : memref<1x8x32xf32, #tpu.memory_space<vmem>>, vector<1x8x32xf32>
    %1 = vector.shape_cast %0 : vector<1x8x32xf32> to vector<8x32xf32>
    %c0_2 = arith.constant 0 : index
    %c0_3 = arith.constant 0 : index
    %2 = vector.load %arg3[%c0_2, %c0_3] : memref<32x512xf32, #tpu.memory_space<vmem>>, vector<32x512xf32>
    %cst = arith.constant dense<0.000000e+00> : vector<8x512xf32>
    %3 = tpu.matmul %1, %2, %cst {dimension_numbers = #tpu.dot_dimension_numbers<[1], [0], [0], [1], [0, 0, 1, 1], [], []>} : vector<8x32xf32>, vector<32x512xf32>, vector<8x512xf32> -> vector<8x512xf32>
    %c0_4 = arith.constant 0 : index
    %c0_5 = arith.constant 0 : index
    %4 = vector.load %arg4[%c0_4, %c0_5] : memref<1x512xf32, #tpu.memory_space<vmem>>, vector<1x512xf32>
    %5 = vector.broadcast %4 : vector<1x512xf32> to vector<8x512xf32>
    %6 = arith.subf %3, %5 : vector<8x512xf32>
    %7 = tpu.iota {dimensions = array<i32: 1>} : vector<8x128xi32>
    %8 = tpu.iota {dimensions = array<i32: 1>} : vector<8x4xi32>
    %9 = tpu.iota {dimensions = array<i32: 0>} : vector<4x128xi32>
    %c0_i32 = arith.constant 0 : i32
    %10 = vector.broadcast %c0_i32 : i32 to vector<8x4xi32>
    %cst_6 = arith.constant 0.000000e+00 : f32
    %11 = vector.broadcast %cst_6 : f32 to vector<4x128xf32>
    %12 = vector.extract_strided_slice %6 {offsets = [0, 0], sizes = [8, 128], strides = [1, 1]} : vector<8x512xf32> to vector<8x128xf32>
    %cst_7 = arith.constant dense<0xFF800000> : vector<8xf32>
    %13 = vector.multi_reduction <maximumf>, %12, %cst_7 [1] : vector<8x128xf32> to vector<8xf32>
    %14 = vector.shape_cast %13 : vector<8xf32> to vector<8x1xf32>
    %15 = vector.broadcast %14 : vector<8x1xf32> to vector<8x128xf32>
    %16 = arith.cmpf oge, %12, %15 : vector<8x128xf32>
    %c128_i32 = arith.constant 128 : i32
    %17 = vector.broadcast %c128_i32 : i32 to vector<8x128xi32>
    %18 = arith.select %16, %7, %17 : vector<8x128xi1>, vector<8x128xi32>
    %cst_8 = arith.constant dense<2147483647> : vector<8xi32>
    %19 = vector.multi_reduction <minsi>, %18, %cst_8 [1] : vector<8x128xi32> to vector<8xi32>
    %20 = vector.shape_cast %19 : vector<8xi32> to vector<8x1xi32>
    %21 = vector.broadcast %20 : vector<8x1xi32> to vector<8x128xi32>
    %22 = arith.cmpi eq, %7, %21 : vector<8x128xi32>
    %23 = arith.extui %22 : vector<8x128xi1> to vector<8x128xi32>
    %24 = arith.sitofp %23 : vector<8x128xi32> to vector<8x128xf32>
    %c0_i32_9 = arith.constant 0 : i32
    %25 = vector.broadcast %c0_i32_9 : i32 to vector<8x4xi32>
    %26 = arith.cmpi eq, %8, %25 : vector<8x4xi32>
    %27 = vector.shape_cast %20 : vector<8x1xi32> to vector<8x1xi32>
    %28 = vector.broadcast %27 : vector<8x1xi32> to vector<8x4xi32>
    %29 = arith.select %26, %28, %10 : vector<8x4xi1>, vector<8x4xi32>
    %c0_i32_10 = arith.constant 0 : i32
    %30 = vector.broadcast %c0_i32_10 : i32 to vector<4x128xi32>
    %31 = arith.cmpi eq, %9, %30 : vector<4x128xi32>
    %cst_11 = arith.constant dense<0.000000e+00> : vector<128xf32>
    %32 = vector.multi_reduction <add>, %24, %cst_11 [0] : vector<8x128xf32> to vector<128xf32>
    %33 = vector.shape_cast %32 : vector<128xf32> to vector<1x128xf32>
    %34 = vector.shape_cast %33 : vector<1x128xf32> to vector<1x128xf32>
    %35 = vector.broadcast %34 : vector<1x128xf32> to vector<4x128xf32>
    %36 = arith.select %31, %35, %11 : vector<4x128xi1>, vector<4x128xf32>
    %37 = vector.extract_strided_slice %6 {offsets = [0, 128], sizes = [8, 128], strides = [1, 1]} : vector<8x512xf32> to vector<8x128xf32>
    %cst_12 = arith.constant dense<0xFF800000> : vector<8xf32>
    %38 = vector.multi_reduction <maximumf>, %37, %cst_12 [1] : vector<8x128xf32> to vector<8xf32>
    %39 = vector.shape_cast %38 : vector<8xf32> to vector<8x1xf32>
    %40 = vector.broadcast %39 : vector<8x1xf32> to vector<8x128xf32>
    %41 = arith.cmpf oge, %37, %40 : vector<8x128xf32>
    %c128_i32_13 = arith.constant 128 : i32
    %42 = vector.broadcast %c128_i32_13 : i32 to vector<8x128xi32>
    %43 = arith.select %41, %7, %42 : vector<8x128xi1>, vector<8x128xi32>
    %cst_14 = arith.constant dense<2147483647> : vector<8xi32>
    %44 = vector.multi_reduction <minsi>, %43, %cst_14 [1] : vector<8x128xi32> to vector<8xi32>
    %45 = vector.shape_cast %44 : vector<8xi32> to vector<8x1xi32>
    %46 = vector.broadcast %45 : vector<8x1xi32> to vector<8x128xi32>
    %47 = arith.cmpi eq, %7, %46 : vector<8x128xi32>
    %48 = arith.extui %47 : vector<8x128xi1> to vector<8x128xi32>
    %49 = arith.sitofp %48 : vector<8x128xi32> to vector<8x128xf32>
    %c1_i32 = arith.constant 1 : i32
    %50 = vector.broadcast %c1_i32 : i32 to vector<8x4xi32>
    %51 = arith.cmpi eq, %8, %50 : vector<8x4xi32>
    %52 = vector.shape_cast %45 : vector<8x1xi32> to vector<8x1xi32>
    %53 = vector.broadcast %52 : vector<8x1xi32> to vector<8x4xi32>
    %54 = arith.select %51, %53, %29 : vector<8x4xi1>, vector<8x4xi32>
    %c1_i32_15 = arith.constant 1 : i32
    %55 = vector.broadcast %c1_i32_15 : i32 to vector<4x128xi32>
    %56 = arith.cmpi eq, %9, %55 : vector<4x128xi32>
    %cst_16 = arith.constant dense<0.000000e+00> : vector<128xf32>
    %57 = vector.multi_reduction <add>, %49, %cst_16 [0] : vector<8x128xf32> to vector<128xf32>
    %58 = vector.shape_cast %57 : vector<128xf32> to vector<1x128xf32>
    %59 = vector.shape_cast %58 : vector<1x128xf32> to vector<1x128xf32>
    %60 = vector.broadcast %59 : vector<1x128xf32> to vector<4x128xf32>
    %61 = arith.select %56, %60, %36 : vector<4x128xi1>, vector<4x128xf32>
    %62 = vector.extract_strided_slice %6 {offsets = [0, 256], sizes = [8, 128], strides = [1, 1]} : vector<8x512xf32> to vector<8x128xf32>
    %cst_17 = arith.constant dense<0xFF800000> : vector<8xf32>
    %63 = vector.multi_reduction <maximumf>, %62, %cst_17 [1] : vector<8x128xf32> to vector<8xf32>
    %64 = vector.shape_cast %63 : vector<8xf32> to vector<8x1xf32>
    %65 = vector.broadcast %64 : vector<8x1xf32> to vector<8x128xf32>
    %66 = arith.cmpf oge, %62, %65 : vector<8x128xf32>
    %c128_i32_18 = arith.constant 128 : i32
    %67 = vector.broadcast %c128_i32_18 : i32 to vector<8x128xi32>
    %68 = arith.select %66, %7, %67 : vector<8x128xi1>, vector<8x128xi32>
    %cst_19 = arith.constant dense<2147483647> : vector<8xi32>
    %69 = vector.multi_reduction <minsi>, %68, %cst_19 [1] : vector<8x128xi32> to vector<8xi32>
    %70 = vector.shape_cast %69 : vector<8xi32> to vector<8x1xi32>
    %71 = vector.broadcast %70 : vector<8x1xi32> to vector<8x128xi32>
    %72 = arith.cmpi eq, %7, %71 : vector<8x128xi32>
    %73 = arith.extui %72 : vector<8x128xi1> to vector<8x128xi32>
    %74 = arith.sitofp %73 : vector<8x128xi32> to vector<8x128xf32>
    %c2_i32 = arith.constant 2 : i32
    %75 = vector.broadcast %c2_i32 : i32 to vector<8x4xi32>
    %76 = arith.cmpi eq, %8, %75 : vector<8x4xi32>
    %77 = vector.shape_cast %70 : vector<8x1xi32> to vector<8x1xi32>
    %78 = vector.broadcast %77 : vector<8x1xi32> to vector<8x4xi32>
    %79 = arith.select %76, %78, %54 : vector<8x4xi1>, vector<8x4xi32>
    %c2_i32_20 = arith.constant 2 : i32
    %80 = vector.broadcast %c2_i32_20 : i32 to vector<4x128xi32>
    %81 = arith.cmpi eq, %9, %80 : vector<4x128xi32>
    %cst_21 = arith.constant dense<0.000000e+00> : vector<128xf32>
    %82 = vector.multi_reduction <add>, %74, %cst_21 [0] : vector<8x128xf32> to vector<128xf32>
    %83 = vector.shape_cast %82 : vector<128xf32> to vector<1x128xf32>
    %84 = vector.shape_cast %83 : vector<1x128xf32> to vector<1x128xf32>
    %85 = vector.broadcast %84 : vector<1x128xf32> to vector<4x128xf32>
    %86 = arith.select %81, %85, %61 : vector<4x128xi1>, vector<4x128xf32>
    %87 = vector.extract_strided_slice %6 {offsets = [0, 384], sizes = [8, 128], strides = [1, 1]} : vector<8x512xf32> to vector<8x128xf32>
    %cst_22 = arith.constant dense<0xFF800000> : vector<8xf32>
    %88 = vector.multi_reduction <maximumf>, %87, %cst_22 [1] : vector<8x128xf32> to vector<8xf32>
    %89 = vector.shape_cast %88 : vector<8xf32> to vector<8x1xf32>
    %90 = vector.broadcast %89 : vector<8x1xf32> to vector<8x128xf32>
    %91 = arith.cmpf oge, %87, %90 : vector<8x128xf32>
    %c128_i32_23 = arith.constant 128 : i32
    %92 = vector.broadcast %c128_i32_23 : i32 to vector<8x128xi32>
    %93 = arith.select %91, %7, %92 : vector<8x128xi1>, vector<8x128xi32>
    %cst_24 = arith.constant dense<2147483647> : vector<8xi32>
    %94 = vector.multi_reduction <minsi>, %93, %cst_24 [1] : vector<8x128xi32> to vector<8xi32>
    %95 = vector.shape_cast %94 : vector<8xi32> to vector<8x1xi32>
    %96 = vector.broadcast %95 : vector<8x1xi32> to vector<8x128xi32>
    %97 = arith.cmpi eq, %7, %96 : vector<8x128xi32>
    %98 = arith.extui %97 : vector<8x128xi1> to vector<8x128xi32>
    %99 = arith.sitofp %98 : vector<8x128xi32> to vector<8x128xf32>
    %c3_i32 = arith.constant 3 : i32
    %100 = vector.broadcast %c3_i32 : i32 to vector<8x4xi32>
    %101 = arith.cmpi eq, %8, %100 : vector<8x4xi32>
    %102 = vector.shape_cast %95 : vector<8x1xi32> to vector<8x1xi32>
    %103 = vector.broadcast %102 : vector<8x1xi32> to vector<8x4xi32>
    %104 = arith.select %101, %103, %79 : vector<8x4xi1>, vector<8x4xi32>
    %c3_i32_25 = arith.constant 3 : i32
    %105 = vector.broadcast %c3_i32_25 : i32 to vector<4x128xi32>
    %106 = arith.cmpi eq, %9, %105 : vector<4x128xi32>
    %cst_26 = arith.constant dense<0.000000e+00> : vector<128xf32>
    %107 = vector.multi_reduction <add>, %99, %cst_26 [0] : vector<8x128xf32> to vector<128xf32>
    %108 = vector.shape_cast %107 : vector<128xf32> to vector<1x128xf32>
    %109 = vector.shape_cast %108 : vector<1x128xf32> to vector<1x128xf32>
    %110 = vector.broadcast %109 : vector<1x128xf32> to vector<4x128xf32>
    %111 = arith.select %106, %110, %86 : vector<4x128xi1>, vector<4x128xf32>
    %112 = tpu.concatenate %24, %49, %74, %99 in 1 : vector<8x128xf32>, vector<8x128xf32>, vector<8x128xf32>, vector<8x128xf32> -> vector<8x512xf32>
    %c0_27 = arith.constant 0 : index
    %c0_28 = arith.constant 0 : index
    %113 = vector.load %arg3[%c0_27, %c0_28] : memref<32x512xf32, #tpu.memory_space<vmem>>, vector<32x512xf32>
    %cst_29 = arith.constant dense<0.000000e+00> : vector<8x32xf32>
    %114 = tpu.matmul %112, %113, %cst_29 {dimension_numbers = #tpu.dot_dimension_numbers<[1], [1], [0], [0], [0, 0, 1, 0], [], []>} : vector<8x512xf32>, vector<32x512xf32>, vector<8x32xf32> -> vector<8x32xf32>
    %c0_30 = arith.constant 0 : index
    %c0_31 = arith.constant 0 : index
    %c0_32 = arith.constant 0 : index
    %115 = vector.load %arg5[%c0_30, %c0_31, %c0_32] : memref<1x8x32xf32, #tpu.memory_space<vmem>>, vector<1x8x32xf32>
    %116 = vector.shape_cast %115 : vector<1x8x32xf32> to vector<8x32xf32>
    %117 = vector.shape_cast %114 : vector<8x32xf32> to vector<1x8x32xf32>
    tpu.vector_store %arg5[%c0_30, %c0_31, %c0_32], %117 {strides = array<i32>} : memref<1x8x32xf32, #tpu.memory_space<vmem>>, vector<1x8x32xf32>,
    %c0_33 = arith.constant 0 : index
    %c0_34 = arith.constant 0 : index
    %c0_35 = arith.constant 0 : index
    %118 = vector.load %arg6[%c0_33, %c0_34, %c0_35] : memref<1x8x4xi32, #tpu.memory_space<vmem>>, vector<1x8x4xi32>
    %119 = vector.shape_cast %118 : vector<1x8x4xi32> to vector<8x4xi32>
    %120 = vector.shape_cast %104 : vector<8x4xi32> to vector<1x8x4xi32>
    tpu.vector_store %arg6[%c0_33, %c0_34, %c0_35], %120 {strides = array<i32>} : memref<1x8x4xi32, #tpu.memory_space<vmem>>, vector<1x8x4xi32>,
    %c0_36 = arith.constant 0 : index
    %c0_37 = arith.constant 0 : index
    %c0_38 = arith.constant 0 : index
    %c0_39 = arith.constant 0 : index
    %121 = vector.load %arg7[%c0_36, %c0_37, %c0_38, %c0_39] : memref<1x1x4x128xf32, #tpu.memory_space<vmem>>, vector<1x1x4x128xf32>
    %122 = vector.shape_cast %121 : vector<1x1x4x128xf32> to vector<4x128xf32>
    %123 = vector.shape_cast %111 : vector<4x128xf32> to vector<1x1x4x128xf32>
    tpu.vector_store %arg7[%c0_36, %c0_37, %c0_38, %c0_39], %123 {strides = array<i32>} : memref<1x1x4x128xf32, #tpu.memory_space<vmem>>, vector<1x1x4x128xf32>,
    %124 = arith.subf %1, %114 : vector<8x32xf32>
    %125 = arith.mulf %124, %124 : vector<8x32xf32>
    %126 = vector.shape_cast %125 : vector<8x32xf32> to vector<1x8x32xf32>
    %cst_40 = arith.constant dense<0.000000e+00> : vector<1xf32>
    %127 = vector.multi_reduction <add>, %126, %cst_40 [1, 2] : vector<1x8x32xf32> to vector<1xf32>
    %128 = vector.shape_cast %127 : vector<1xf32> to vector<1x1x1xf32>
    %129 = vector.extract %128[0, 0, 0] : f32 from vector<1x1x1xf32>
    %130 = vector.broadcast %129 : f32 to vector<1x1x1x1xf32>
    %c0_41 = arith.constant 0 : index
    %c0_42 = arith.constant 0 : index
    %c0_43 = arith.constant 0 : index
    %c0_44 = arith.constant 0 : index
    %131 = vector.load %arg8[%c0_41, %c0_42, %c0_43, %c0_44] : memref<1x1x1x1xf32, #tpu.memory_space<vmem>>, vector<1x1x1x1xf32>
    tpu.vector_store %arg8[%c0_41, %c0_42, %c0_43, %c0_44], %130 {strides = array<i32>} : memref<1x1x1x1xf32, #tpu.memory_space<vmem>>, vector<1x1x1x1xf32>,
    return
  }
  func.func @transform_0(%arg0: i32, %arg1: i32) -> (i32, i32, i32) {
    %c0_i32 = arith.constant 0 : i32
    %c0_i32_0 = arith.constant 0 : i32
    return %arg0, %arg1, %c0_i32 : i32, i32, i32
  }
  func.func @transform_1(%arg0: i32, %arg1: i32) -> (i32, i32) {
    %c0_i32 = arith.constant 0 : i32
    %c0_i32_0 = arith.constant 0 : i32
    %c0_i32_1 = arith.constant 0 : i32
    return %c0_i32, %c0_i32_0 : i32, i32
  }
  func.func @transform_2(%arg0: i32, %arg1: i32) -> (i32, i32) {
    %c0_i32 = arith.constant 0 : i32
    %c0_i32_0 = arith.constant 0 : i32
    %c0_i32_1 = arith.constant 0 : i32
    return %c0_i32, %c0_i32_0 : i32, i32
  }
  func.func @transform_3(%arg0: i32, %arg1: i32) -> (i32, i32, i32) {
    %c0_i32 = arith.constant 0 : i32
    %c0_i32_0 = arith.constant 0 : i32
    return %arg0, %arg1, %c0_i32 : i32, i32, i32
  }
  func.func @transform_4(%arg0: i32, %arg1: i32) -> (i32, i32, i32) {
    %c0_i32 = arith.constant 0 : i32
    %c0_i32_0 = arith.constant 0 : i32
    return %arg0, %arg1, %c0_i32 : i32, i32, i32
  }
  func.func @transform_5(%arg0: i32, %arg1: i32) -> (i32, i32, i32, i32) {
    %c0_i32 = arith.constant 0 : i32
    %c0_i32_0 = arith.constant 0 : i32
    %c0_i32_1 = arith.constant 0 : i32
    return %arg0, %arg1, %c0_i32, %c0_i32_0 : i32, i32, i32, i32
  }
  func.func @transform_6(%arg0: i32, %arg1: i32) -> (i32, i32, i32, i32) {
    %c0_i32 = arith.constant 0 : i32
    %c0_i32_0 = arith.constant 0 : i32
    %c0_i32_1 = arith.constant 0 : i32
    return %arg0, %arg1, %c0_i32, %c0_i32_0 : i32, i32, i32, i32
  }
}

</mosaic_0001>

<bundles_post_ra>
// kernel: tpu_custom_call.1
= control target key start
LH: loop header
LB: loop body
LE: loop exit
PB: predicated region body
PF: predicated region fallthrough
CT: control target
= control target key end

     0   :  { %s1722_s0 = inlined_call_operand.hbm [shape: f32[2,8,32], index: 0, kind: input, shape index: {}]   ;;  %s1723_s1 = inlined_call_operand.hbm [shape: f32[32,512], index: 1, kind: input, shape index: {}]   ;;  %s1724_s2 = inlined_call_operand.vmem [shape: f32[1,512], index: 2, kind: input, shape index: {}]   ;;  %s1725_s3 = inlined_call_operand.hbm [shape: f32[2,8,32], index: 3, kind: output, shape index: {0}]   ;;  %s1726_s4 = inlined_call_operand.vmem [shape: s32[2,8,4], index: 4, kind: output, shape index: {1}]   ;;  %s1727_s5 = inlined_call_operand.hbm [shape: f32[2,1,4,128], index: 5, kind: output, shape index: {2}]   ;;  %s1728_s6 = inlined_call_operand.vmem [shape: f32[2,1,1,1], index: 6, kind: output, shape index: {3}]  }
   0x1   :  { %1733 = sst [smem:[#allocation14_spill]] %s1722_s0 }
   0x2   :  { %1734 = sst [smem:[#allocation15_spill]] %s1723_s1 }
   0x3   :  { %12 = vsyncpa [#allocation3], 0 }
   0x4   :  { %14 = vsyncpa [#allocation3 + $0x1], 0 }
   0x5   :  { %15 = vsyncpa [#allocation6], 0 }
   0x6   :  { %16 = vsyncpa [#allocation4], 0 }
   0x7   :  { %18 = vsyncpa [#allocation4 + $0x1], 0 }
   0x8   :  { %19 = vsyncpa [#allocation9], 0 }
   0x9   :  { %21 = vsyncpa [#allocation9 + $0x1], 0  ;;  %s1422_s21 = smov 0   ;;  %s1424_s22 = smov 0  }
   0xa   :  { %s1426_s23 = smov 0   ;;  %s1428_s24 = smov 0  }
   0xb   :  { %s1430_s25 = smov 0   ;;  %s1432_s26 = smov 0  }
   0xc LB: > { %s1055_s27 = sadd.s32 4294967295, %s1377_s26   ;;  %s1056_s28 = sadd.s32 4294967294, %s1377_s26   ;;  %s1377_s26 = sphi %s1432_s26, %s27_s26   ;;  %s1373_s25 = sphi %s1430_s25, %s1756_s25   ;;  %s1369_s24 = sphi %s1428_s24, %s1755_s24   ;;  %s1365_s23 = sphi %s1426_s23, %s1754_s23   ;;  %s1361_s22 = sphi %s1424_s22, %s1753_s22   ;;  %s1357_s21 = sphi %s1422_s21, %s1752_s21  }
   0xd   : > { %p61_p0 = scmp.ne.s32.totalorder %s1361_s22, %s1357_s21  ;;  %p1456_p1 = scmp.eq.s32.totalorder %s1055_s27, 0 }
   0xe   : > { %p1460_p2 = scmp.eq.s32.totalorder %s1055_s27, 1  ;;  %p135_p3 = scmp.eq.s32.totalorder %s1056_s28, 1 }
   0xf   : > { %s1735_s29 = scalar_select %p1456_p1, 1, 0 }
  0x10   : > { %s1736_s30 = scalar_select %p1460_p2, 1, 0 }
  0x11   : > { %p1466_p4 = por %p1456_p1, %p61_p0  ;;  %p1057_p5 = scmp.ge.s32.totalorder %s1377_s26, 1 }
  0x12   : > { %p1471_p6 = por %p135_p3, %p61_p0  ;;  %p226_p7 = scmp.lt.s32.totalorder %s1377_s26, 3 }
  0x13   : > { %s1737_s7 = scalar_select %p1466_p4, 1, 0 }
  0x14   : > { %s1738_s8 = scalar_select %p1471_p6, 1, 0 }
  0x15   : > { %p1476_p8 = pnand %p1057_p5, %p226_p7  ;;  %s1379_s10 = smov [#allocation5]  }
  0x16   : > { %s238_s11 = sshll.u32 %s1379_s10, 4  ;;  %s39_s13 = sadd.s32 1, %s1373_s25  ;;  %s239_s11 = int_to_ptr.vmem [resolvable:$true] %s238_s11 }
  0x17   : > { %s1739_s9 = scalar_select %p1476_p8, 1, 0 }
  0x18   : > { %p1129_p9 = pneg %p1476_p8  ;;  %s1741_s1 = sld [smem:[#allocation15_spill]] }
  0x1a   : > { %p1485_p11 = pnand %p1129_p9, %p1456_p1 }
  0x1c   : > { %p1203_p13 = pneg %p1485_p11 }
  0x1e   : > { %s1201_s16 = scalar_lea.hbm %s1741_s1, 2048 }
  0x1f   : > { %p1202_p12 = scmp.ne.s32.totalorder %s1741_s1, %s1201_s16  ;;  %p1208_p5 = scmp.lt.u32.totalorder %s1201_s16, %s1741_s1 }
  0x21   : > { %p1204_p0 = pnand %p1203_p13, %p1202_p12 }
  0x23   : > { %p1205_p3 = pneg %p1204_p0 }
  0x25   : > { %p1210_p7 = pnand %p1208_p5, %p1205_p3 }
  0x27   : > { %1213 = shalt.err (!%p1210_p7)
}
  0x28   : > { %s1214_s27 = scalar_lea.vmem %s239_s11, 2048  ;;  %p1222_p1 = scmp.lt.s32.totalorder %s239_s11, %s239_s11 }
  0x29   : > { %p1215_p9 = scmp.ne.s32.totalorder %s239_s11, %s1214_s27  ;;  %p1223_p4 = scmp.lt.s32.totalorder %s1214_s27, %s1214_s27 }
  0x2b   : > { %p1217_p10 = pnand %p1215_p9, %p1203_p13  ;;  %p1224_p8 = por %p1223_p4, %p1222_p1 }
  0x2d   : > { %p1218_p6 = pneg %p1217_p10 }
  0x2f   : > { %p1225_p2 = pnand %p1224_p8, %p1218_p6 }
  0x31   : > { %1228 = shalt.err (!%p1225_p2)
}
  0x32   : > { %s1380_s28 = smov 512   ;;  %s1381_s10 = smov 32  }
  0x33   : > { %1132 = dma.hbm_to_vmem [thread:$0]  (!%p1485_p11), %s1741_s1, 2048, %s239_s11, [#allocation6], %s1380_s28, %s1380_s28, %s1381_s10  }
  0x34   : > { %p41_p1 = scmp.ge.s32.totalorder %s39_s13, 2  ;;  %s48_s16 = sadd.s32 1, %s1365_s23 }
  0x35   : > { %p55_p2 = scmp.ne.s32.totalorder %s1365_s23, %s1361_s22  ;;  %p56_p4 = scmp.eq.s32.totalorder %s1377_s26, 0 }
  0x36   : > { %s1758_s13 = smov (%p41_p1, %s39_s13), 0  ;;  %p1743_p8 = scmp.ne.s32.totalorder %s1736_s30, 0 }
  0x37   : > { %p1512_p6 = por %p56_p4, %p55_p2  ;;  %s43_s12 = ssub.s32 %s1373_s25, %s1758_s13 }
  0x38   : > { %p1518_p10 = por %p1743_p8, %p55_p2  ;;  %p1145_p12 = scmp.lt.s32.totalorder %s1377_s26, 2 }
  0x39   : > { %p46_p11 = scmp.eq.s32.totalorder %s43_s12, 0  ;;  %s255_s11 = sand.u32 1, %s1365_s23  }
  0x3a   : > { %s1060_s19 = sshll.u32 %s255_s11, 3  ;;  %s1061_s27 = sshll.u32 %s1373_s25, 7 }
  0x3b   : > { %s1527_s20 = scalar_select %p46_p11, %s1365_s23, %s48_s16  }
  0x3c   : > { %s1745_s0 = sld [smem:[#allocation14_spill]]  ;;  %s259_s30 = scalar_lea.vmem [#allocation2], %s1060_s19 }
  0x3d   : > { %s267_s15 = sshll.u32 %s259_s30, 4  ;;  %p1539_p13 = pnand %p1145_p12, %p1512_p6  ;;  %s1535_s15 = int_to_ptr.vmem [resolvable:$true] %s267_s15 }
  0x3e   : > { %s256_s16 = scalar_lea.sflag [#allocation3], %s255_s11 }
  0x3f   : > { %p1231_p3 = pneg %p1539_p13 }
  0x42   : > { %s1533_s14 = scalar_lea.hbm %s1745_s0, %s1061_s27  ;;  %s1234_s28 = scalar_lea.hbm %s1745_s0, 256 }
  0x43   : > { %s1229_s1 = scalar_lea.hbm %s1533_s14, 128  ;;  %p1235_p9 = scmp.lt.u32.totalorder %s1533_s14, %s1745_s0 }
  0x44   : > { %p1230_p0 = scmp.ne.s32.totalorder %s1533_s14, %s1229_s1  ;;  %p1236_p1 = scmp.lt.u32.totalorder %s1234_s28, %s1229_s1 }
  0x45   : > { %p1238_p4 = scmp.lt.u32.totalorder %s1229_s1, %s1533_s14 }
  0x46   : > { %p1232_p5 = pnand %p1231_p3, %p1230_p0  ;;  %p1237_p2 = por %p1236_p1, %p1235_p9 }
  0x48   : > { %p1233_p7 = pneg %p1232_p5  ;;  %p1239_p6 = por %p1238_p4, %p1237_p2 }
  0x4a   : > { %p1240_p8 = pnand %p1239_p6, %p1233_p7 }
  0x4c   : > { %1243 = shalt.err (!%p1240_p8)
}
  0x4d   : > { %s1244_s11 = scalar_lea.vmem %s1535_s15, 128  ;;  %s1382_s30 = smov [#allocation2]  }
  0x4e   : > { %p1245_p12 = scmp.ne.s32.totalorder %s1535_s15, %s1244_s11  ;;  %s1249_s19 = sshll.u32 %s1382_s30, 4  ;;  %s1250_s19 = int_to_ptr.vmem [resolvable:$false] %s1249_s19 }
  0x4f   : > { %s1251_s27 = scalar_lea.vmem %s1250_s19, 256  ;;  %p1252_p5 = scmp.lt.s32.totalorder %s1535_s15, %s1250_s19 }
  0x50   : > { %p1247_p11 = pnand %p1245_p12, %p1231_p3  ;;  %p1253_p9 = scmp.lt.s32.totalorder %s1251_s27, %s1244_s11 }
  0x52   : > { %p1248_p0 = pneg %p1247_p11  ;;  %p1254_p1 = por %p1253_p9, %p1252_p5 }
  0x54   : > { %p1255_p2 = pnand %p1254_p1, %p1248_p0 }
  0x56   : > { %1258 = shalt.err (!%p1255_p2)
}
  0x57   : > { %1136 = dma.hbm_to_vmem [thread:$0]  (!%p1539_p13), %s1533_s14, 128, %s1535_s15, %s256_s16  }
  0x58   : > { %p1747_p7 = scmp.ne.s32.totalorder %s1739_s9, 0 }
  0x59   : > { %s1571_s1 = sand.u32 (!%p1747_p7), 1, %s1361_s22   ;;  %p1748_p3 = scmp.ne.s32.totalorder (!%p1747_p7), %s1737_s7, 0 }
  0x5a   : > { %276 = sbr.rel (%p1747_p7) target bundleno = 1200 (0x4b0), region = 32  ;;  %s1063_s28 = sshll.u32 (!%p1747_p7), %s1571_s1, 3 }
  0x5b   : > { %s279_s17 = scalar_lea.sflag (!%p1747_p7), [#allocation3], %s1571_s1  ;;  %s1577_s10 = scalar_lea.vmem (!%p1747_p7), [#allocation2], %s1063_s28 }
  0x61   : > { %1340 = dma.done.wait (%p1748_p3), %s279_s17, 128  }
  0x62   : > { %1342 = vsyncadd (%p1748_p3), %s279_s17, 4294967168  ;;  %p1749_p13 = scmp.ne.s32.totalorder %s1735_s29, 0 }
  0x64   : > { %1344 = dma.done.wait (%p1749_p13), [#allocation6], 2048  }
  0x65   : > { %1346 = vsyncadd (%p1749_p13), [#allocation6], 4294965248  ;;  %v1383_v0 = vmov 0.0   ;;  %v348_v1 = vld [vmem:[#allocation5 + $0x8] sm:$0xff]  ;;  %v347_v3 = vld [vmem:[#allocation5] sm:$0xff]  ;;  %vm363_vm0 = vcmask 261120   ;;  %v511_v26 = vlaneseq }
  0x66   : > { %431 = vmatprep.mubr.f32.mxu0 %v1383_v0  ;;  %502 = vmatprep.mubr.f32.mxu1 %v1383_v0  ;;  %v352_v2 = vld [vmem:[#allocation5 + $0x28] sm:$0xff]  ;;  %v351_v5 = vld [vmem:[#allocation5 + $0x20] sm:$0xff]  ;;  %v350_v6 = vld [vmem:[#allocation5 + $0x18] sm:$0xff]  ;;  %p333_p4 = scmp.lt.s32.totalorder %s1369_s24, 1  ;;  %s1066_s11 = sshll.u32 %s1571_s1, 2 }
  0x67   : > { %v1084_v4 = vpack.c.bf16 %v352_v2, %v348_v1  ;;  %v354_v7 = vld [vmem:[#allocation5 + $0x38] sm:$0xff]  ;;  %v1086_v8 = vpack.c.bf16 %v351_v5, %v347_v3  ;;  %v356_v10 = vld [vmem:[#allocation5 + $0x48] sm:$0xff]  ;;  %v349_v12 = vld [vmem:[#allocation5 + $0x10] sm:$0xff]  ;;  %v1596_v27 = vshrl.u32 %v511_v26, 7  ;;  %v1605_v45 = vand.u32 127, %v511_v26  ;;  %s1638_s30 = scalar_lea.vmem [#allocation8], %s1066_s11 }
  0x68   : > { %v1092_v9 = vpack.c.bf16 %v354_v7, %v350_v6  ;;  %v360_v11 = vld [vmem:[#allocation5 + $0x68] sm:$0xff]  ;;  %v353_v14 = vld [vmem:[#allocation5 + $0x30] sm:$0xff]  ;;  %v355_v15 = vld [vmem:[#allocation5 + $0x40] sm:$0xff]  ;;  %s1614_s9 = scalar_select %p333_p4, %s1369_s24, 1 }
  0x69   : > { %1085 = vmatprep.subr.bf16.mxu0 %v1084_v4  ;;  %v1088_v13 = vpack.c.bf16 %v360_v11, %v356_v10  ;;  %v359_v16 = vld [vmem:[#allocation5 + $0x60] sm:$0xff]  ;;  %v1094_v17 = vpack.c.bf16 %v353_v14, %v349_v12  ;;  %v358_v19 = vld [vmem:[#allocation5 + $0x58] sm:$0xff]  ;;  %v357_v22 = vld [vmem:[#allocation5 + $0x50] sm:$0xff]  ;;  %v513_v28 = vsub.s32 0, %v1596_v27  ;;  %v517_v30 = vsub.s32 1, %v1596_v27  ;;  %s308_s19 = scalar_lea.vmem [#allocation7], %s1063_s28 }
  0x6a   : > { %1087 = vmatpush1.bf16.msra.mxu0 %v1086_v8  ;;  %1093 = vmatprep.subr.bf16.mxu1 %v1092_v9  ;;  %v1090_v18 = vpack.c.bf16 %v359_v16, %v355_v15  ;;  %v362_v20 = vld [vmem:[#allocation5 + $0x78] sm:$0xff]  ;;  %v361_v23 = vld [vmem:[#allocation5 + $0x70] sm:$0xff]  ;;  %v521_v31 = vsub.s32 2, %v1596_v27  ;;  %v525_v32 = vsub.s32 3, %v1596_v27  ;;  %vm560_vm10 = vcmp.eq.s32.totalorder %v1605_v45, 0  ;;  %s1067_s14 = sshll.u32 %s1614_s9, 3 }
  0x6b   : > { %1089 = vmatprep.subr.bf16.mxu0 %v1088_v13  ;;  %v1096_v21 = vpack.c.bf16 %v362_v20, %v358_v19  ;;  %1095 = vmatpush1.bf16.msra.mxu1 %v1094_v17  ;;  %v1098_v24 = vpack.c.bf16 %v361_v23, %v357_v22  ;;  %v1590_v25 = vld [vmem:[%s1577_s10] sm:$0xff]  ;;  %vm591_vm11 = vcmp.eq.s32.totalorder %v1605_v45, 1  ;;  %vm622_vm13 = vcmp.eq.s32.totalorder %v1605_v45, 2  ;;  %s339_s16 = scalar_lea.vmem %s1726_s4, %s1067_s14  ;;  %s1080_s27 = sshll.u32 %s1369_s24, 7 }
  0x6c   : > { %v509_v29 = vld [vmem:[%s1724_s2] sm:$0xf]  ;;  %vm653_vm15 = vcmp.eq.s32.totalorder %v1605_v45, 3  ;;  %s855_s17 = sshll.u32 %s308_s19, 4  ;;  %s1650_s7 = scalar_lea.hbm %s1725_s3, %s1080_s27  ;;  %s856_s17 = int_to_ptr.vmem [resolvable:$true] %s855_s17 }
  0x6d   : > { %1097 = vmatprep.subr.bf16.mxu1 %v1096_v21  ;;  %v514_v33 = vrot.slane %v509_v29, %v513_v28  ;;  %v518_v34 = vrot.slane %v509_v29, %v517_v30  ;;  %v522_v35 = vrot.slane %v509_v29, %v521_v31  ;;  %v526_v37 = vrot.slane %v509_v29, %v525_v32  ;;  %s823_s14 = scalar_lea.sflag [#allocation4], %s1571_s1  ;;  %s1259_s15 = scalar_lea.vmem %s856_s17, 128 }
  0x6e   : > { %1091 = vmatpush1.bf16.msra.mxu0 %v1090_v18  ;;  %v1384_v32 = vmov 1.0   ;;  %p1260_p6 = scmp.ne.s32.totalorder %s856_s17, %s1259_s15  ;;  %s1385_s28 = smov [#allocation7]  }
  0x6f   : > { %1109 = vmatprep.subr.bf16.mxu0 %v1092_v9  ;;  %1099 = vmatpush1.bf16.msra.mxu1 %v1098_v24  ;;  %s1263_s12 = sshll.u32 %s1385_s28, 4  ;;  %s1264_s12 = int_to_ptr.vmem [resolvable:$false] %s1263_s12 }
  0x70   : > { %1101 = vmatprep.subr.bf16.mxu1 %v1084_v4  ;;  %p1261_p8 = pnand %p1260_p6, %p1518_p10  ;;  %p1266_p11 = scmp.lt.s32.totalorder %s856_s17, %s1264_s12 }
  0x71   : > { %1068 = vmatmul.mubr.msk.f32.vlgmr.msra.gmra.mrb[0].mxu0 %vm363_vm0, %v1590_v25 }
  0x72   : > { %1069 = vmatmul.mubr.msk.f32.vlgmr.msra.gmra.mrb[0].mxu1 %vm363_vm0, %v1590_v25  ;;  %p1262_p12 = pneg %p1261_p8 }
  0x77   : > { %1111 = vmatpush1.bf16.xpose.msra.mxu0 %v1094_v17 }
  0x78   : > { %1113 = vmatprep.subr.bf16.mxu0 %v1096_v21  ;;  %1103 = vmatpush1.bf16.xpose.msra.mxu1 %v1086_v8 }
  0x79   : > { %1105 = vmatprep.subr.bf16.mxu1 %v1088_v13 }
  0x7f   : > { %1115 = vmatpush1.bf16.xpose.msra.mxu0 %v1098_v24 }
  0x80   : > { %1107 = vmatpush1.bf16.xpose.msra.mxu1 %v1090_v18 }
 0x144   : > { %v433_v36 = vpop.f32.mrb[0].mxu0 }
 0x145   : > { %v531_v38 = vsub.f32 %v433_v36, %v514_v33  ;;  %v435_v39 = vpop.f32.mrb[1].mxu0  ;;  %v504_v41 = vpop.f32.mrb[0].mxu1 }
 0x146   : > { %v532_v40 = vsub.f32 %v435_v39, %v518_v34  ;;  %v533_v42 = vsub.f32 %v504_v41, %v522_v35  ;;  %v506_v43 = vpop.f32.mrb[1].mxu1 }
 0x147   : > { %539 = vmax.xlane.f32.xlu1 %v531_v38  ;;  %v534_v44 = vsub.f32 %v506_v43, %v526_v37 }
 0x148   : > { %570 = vmax.xlane.f32.xlu0 %v532_v40 }
 0x14b   : > { %601 = vmax.xlane.f32.xlu1 %v533_v42 }
 0x14c   : > { %632 = vmax.xlane.f32.xlu0 %v534_v44 }
 0x1d4   : > { %v540_v46 = vpop.xlane.xlu1 %539 }
 0x1d5   : > { %vm541_vm1 = vcmp.ge.f32.partialorder %v531_v38, %v540_v46  ;;  %v571_v47 = vpop.xlane.xlu0 %570 }
 0x1d6   : > { %vm572_vm2 = vcmp.ge.f32.partialorder %v532_v40, %v571_v47  ;;  %v542_v48 = vsel %vm541_vm1, %v1605_v45, 128  ;;  %vm804_vm1 = vcmask 31744  }
 0x1d7   : > { %v573_v49 = vsel %vm572_vm2, %v1605_v45, 128  ;;  %v544_v54 = vshra.s32 %v542_v48, 16  ;;  %v543_v63 = vand.u32 65535, %v542_v48 }
 0x1d8   : > { %v602_v50 = vpop.xlane.xlu1 %601  ;;  %v575_v51 = vshra.s32 %v573_v49, 16  ;;  %v574_v62 = vand.u32 65535, %v573_v49 }
 0x1d9   : > { %vm603_vm3 = vcmp.ge.f32.partialorder %v533_v42, %v602_v50  ;;  %v633_v52 = vpop.xlane.xlu0 %632  ;;  %v546_v58 = vcvt.s32.f32 %v544_v54  ;;  %v545_v9 = vcvt.s32.f32 %v543_v63 }
 0x1da   : > { %vm634_vm4 = vcmp.ge.f32.partialorder %v534_v44, %v633_v52  ;;  %v577_v53 = vcvt.s32.f32 %v575_v51  ;;  %v604_v55 = vsel %vm603_vm3, %v1605_v45, 128  ;;  %v576_v3 = vcvt.s32.f32 %v574_v62 }
 0x1db   : > { %v635_v56 = vsel %vm634_vm4, %v1605_v45, 128  ;;  %v606_v60 = vshra.s32 %v604_v55, 16  ;;  %v605_v5 = vand.u32 65535, %v604_v55  ;;  %vm562_vm3 = vcmp.eq.s32.totalorder %v1596_v27, 0 }
 0x1dc   : > { %578 = vmin.xlane.f32.xlu0 %v577_v53  ;;  %v637_v57 = vshra.s32 %v635_v56, 16  ;;  %v636_v1 = vand.u32 65535, %v635_v56  ;;  %vm593_vm4 = vcmp.eq.s32.totalorder %v1596_v27, 1 }
 0x1dd   : > { %v608_v61 = vcvt.s32.f32 %v606_v60  ;;  %v607_v13 = vcvt.s32.f32 %v605_v5 }
 0x1de   : > { %v639_v59 = vcvt.s32.f32 %v637_v57  ;;  %v638_v8 = vcvt.s32.f32 %v636_v1 }
 0x1e0   : > { %547 = vmin.xlane.f32.xlu0 %v546_v58  ;;  %640 = vmin.xlane.f32.xlu1 %v639_v59 }
 0x1e4   : > { %609 = vmin.xlane.f32.xlu1 %v608_v61 }
 0x269   : > { %v579_v2 = vpop.xlane.xlu0 %578 }
 0x26a   : > { %vm580_vm5 = vcmp.eq.f32.partialorder %v577_v53, %v579_v2  ;;  %v585_v15 = vcvt.f32.s32 %v579_v2 }
 0x26b   : > { %v581_v4 = vsel %vm580_vm5, %v576_v3, inf  ;;  %vm624_vm5 = vcmp.eq.s32.totalorder %v1596_v27, 2 }
 0x26c   : > { %582 = vmin.xlane.f32.xlu0 %v581_v4  ;;  %v586_v18 = vshll.u32 %v585_v15, 16 }
 0x26d   : > { %v641_v6 = vpop.xlane.xlu1 %640  ;;  %v548_v7 = vpop.xlane.xlu0 %547 }
 0x26e   : > { %vm642_vm6 = vcmp.eq.f32.partialorder %v639_v59, %v641_v6  ;;  %vm549_vm7 = vcmp.eq.f32.partialorder %v546_v58, %v548_v7  ;;  %v647_v16 = vcvt.f32.s32 %v641_v6  ;;  %v554_v19 = vcvt.f32.s32 %v548_v7 }
 0x26f   : > { %v643_v10 = vsel %vm642_vm6, %v638_v8, inf  ;;  %v550_v11 = vsel %vm549_vm7, %v545_v9, inf  ;;  %vm655_vm6 = vcmp.eq.s32.totalorder %v1596_v27, 3 }
 0x270   : > { %644 = vmin.xlane.f32.xlu1 %v643_v10  ;;  %551 = vmin.xlane.f32.xlu0 %v550_v11  ;;  %v648_v22 = vshll.u32 %v647_v16, 16  ;;  %v555_v28 = vshll.u32 %v554_v19, 16 }
 0x271   : > { %v610_v12 = vpop.xlane.xlu1 %609 }
 0x272   : > { %vm611_vm8 = vcmp.eq.f32.partialorder %v608_v61, %v610_v12  ;;  %v616_v23 = vcvt.f32.s32 %v610_v12 }
 0x273   : > { %v612_v14 = vsel %vm611_vm8, %v607_v13, inf }
 0x274   : > { %613 = vmin.xlane.f32.xlu1 %v612_v14  ;;  %v617_v36 = vshll.u32 %v616_v23, 16 }
 0x2f9   : > { %v583_v17 = vpop.xlane.xlu0 %582 }
 0x2fa   : > { %v584_v20 = vcvt.f32.s32 %v583_v17 }
 0x2fc   : > { %v587_v21 = vadd.s32 %v586_v18, %v584_v20 }
 0x2fd   : > { %v645_v24 = vpop.xlane.xlu1 %644  ;;  %v552_v26 = vpop.xlane.xlu0 %551 }
 0x2fe   : > { %v646_v29 = vcvt.f32.s32 %v645_v24  ;;  %v553_v30 = vcvt.f32.s32 %v552_v26  ;;  %vm588_vm9 = vcmp.eq.s32.totalorder %v1605_v45, %v587_v21 }
 0x2ff   : > { %v1071_v31 = vsel %vm588_vm9, 1.0, %v1383_v0  ;;  %1074 = vmatprep.mubr.msk.f32.mxu1 %vm588_vm9, %v1384_v32 }
 0x300   : > { %v649_v33 = vadd.s32 %v648_v22, %v646_v29  ;;  %v556_v34 = vadd.s32 %v555_v28, %v553_v30  ;;  %v594_v35 = vrot.slane %v1071_v31, 4 }
 0x301   : > { %v614_v37 = vpop.xlane.xlu1 %613 }
 0x302   : > { %vm557_vm12 = vcmp.eq.s32.totalorder %v1605_v45, %v556_v34  ;;  %v561_v38 = vsel %vm560_vm10, %v556_v34, 0  ;;  %v595_v39 = vadd.f32 %v1071_v31, %v594_v35  ;;  %v615_v40 = vcvt.f32.s32 %v614_v37 }
 0x303   : > { %v1070_v41 = vsel %vm557_vm12, 1.0, %v1383_v0  ;;  %1075 = vmatmul.mubr.msk.f32.vlgmr.msra.gmra.mrb[2].mxu1 %vm557_vm12, %v1384_v32  ;;  %vm650_vm14 = vcmp.eq.s32.totalorder %v1605_v45, %v649_v33  ;;  %v592_v46 = vsel %vm591_vm11, %v587_v21, %v561_v38 }
 0x304   : > { %v563_v42 = vrot.slane %v1070_v41, 4  ;;  %v618_v43 = vadd.s32 %v617_v36, %v615_v40  ;;  %v1073_v44 = vsel %vm650_vm14, 1.0, %v1383_v0  ;;  %1076 = vmatprep.mubr.msk.f32.mxu0 %vm650_vm14, %v1384_v32  ;;  %v596_v47 = vrot.slane %v595_v39, 2 }
 0x305   : > { %v656_v48 = vrot.slane %v1073_v44, 4 }
 0x306   : > { %v564_v49 = vadd.f32 %v1070_v41, %v563_v42  ;;  %vm619_vm2 = vcmp.eq.s32.totalorder %v1605_v45, %v618_v43  ;;  %v623_v50 = vsel %vm622_vm13, %v618_v43, %v592_v46  ;;  %v597_v56 = vadd.f32 %v596_v47, %v595_v39 }
 0x307   : > { %v1072_v51 = vsel %vm619_vm2, 1.0, %v1383_v0  ;;  %v654_v52 = vsel %vm653_vm15, %v649_v33, %v623_v50  ;;  %v657_v53 = vadd.f32 %v1073_v44, %v656_v48  ;;  %1077 = vmatmul.mubr.msk.f32.vlgmr.msra.gmra.mrb[2].mxu0 %vm619_vm2, %v1384_v32 }
 0x308   : > { %v565_v54 = vrot.slane %v564_v49, 2  ;;  %v625_v55 = vrot.slane %v1072_v51, 4  ;;  %805 = vst.msk [vmem:[%s339_s16] sm:$0xff] %vm804_vm1, %v654_v52  ;;  %v598_v45 = vrot.slane %v597_v56, 1  ;;  %s1265_s16 = scalar_lea.vmem %s1264_s12, 256 }
 0x309   : > { %v658_v57 = vrot.slane %v657_v53, 2  ;;  %p1267_p0 = scmp.lt.s32.totalorder %s1265_s16, %s1259_s15 }
 0x30a   : > { %v566_v58 = vadd.f32 %v565_v54, %v564_v49  ;;  %v626_v59 = vadd.f32 %v1072_v51, %v625_v55  ;;  %v599_v4 = vadd.f32 %v598_v45, %v597_v56 }
 0x30b   : > { %v659_v60 = vadd.f32 %v658_v57, %v657_v53  ;;  %p1268_p5 = por %p1267_p0, %p1266_p11 }
 0x30c   : > { %v567_v61 = vrot.slane %v566_v58, 1  ;;  %v627_v62 = vrot.slane %v626_v59, 2 }
 0x30d   : > { %v660_v0 = vrot.slane %v659_v60, 1  ;;  %p1269_p9 = pnand %p1268_p5, %p1262_p12 }
 0x30e   : > { %v568_v63 = vadd.f32 %v567_v61, %v566_v58  ;;  %v628_v1 = vadd.f32 %v627_v62, %v626_v59 }
 0x30f   : > { %v661_v6 = vadd.f32 %v660_v0, %v659_v60 }
 0x310   : > { %v569_v2 = vsel %vm562_vm3, %v568_v63, 0.0  ;;  %v629_v3 = vrot.slane %v628_v1, 1 }
 0x311   : > { %v600_v7 = vsel %vm593_vm4, %v599_v4, %v569_v2 }
 0x312   : > { %v630_v5 = vadd.f32 %v629_v3, %v628_v1 }
 0x314   : > { %v631_v8 = vsel %vm624_vm5, %v630_v5, %v600_v7 }
 0x315   : > { %v662_v9 = vsel %vm655_vm6, %v661_v6, %v631_v8 }
 0x316   : > { %806 = vst [vmem:[%s1638_s30] sm:$0xf] %v662_v9 }
 0x3d6   : > { %v729_v10 = vpop.f32.mrb[2].mxu1 }
 0x3d7   : > { %v731_v11 = vpop.f32.mrb[3].mxu1 }
 0x3da   : > { %v799_v12 = vpop.f32.mrb[2].mxu0 }
 0x3db   : > { %v800_v13 = vadd.f32 %v799_v12, %v729_v10  ;;  %v801_v14 = vpop.f32.mrb[3].mxu0 }
 0x3dd   : > { %v807_v15 = vsub.f32 %v1590_v25, %v800_v13  ;;  %803 = vst.msk [vmem:[%s308_s19] sm:$0xff] %vm363_vm0, %v800_v13 }
 0x3df   : > { %v808_v27 = vmul.f32 %v807_v15, %v807_v15 }
 0x3e1   : > { %v809_v16 = vsel %vm363_vm0, %v808_v27, 0.0 }
 0x3e2   : > { %810 = vadd.xlane.f32.xlu0 %v809_v16 }
 0x3e3   : > { %1272 = shalt.err (!%p1269_p9)
}
 0x3e4   : > { %s1273_s11 = scalar_lea.hbm %s1650_s7, 128  ;;  %s1277_s10 = scalar_lea.hbm %s1725_s3, 256 }
 0x3e5   : > { %p1274_p1 = scmp.ne.s32.totalorder %s1650_s7, %s1273_s11  ;;  %p1278_p3 = scmp.lt.u32.totalorder %s1650_s7, %s1725_s3 }
 0x3e6   : > { %p1279_p13 = scmp.lt.u32.totalorder %s1277_s10, %s1273_s11  ;;  %p1281_p6 = scmp.lt.u32.totalorder %s1273_s11, %s1650_s7 }
 0x3e7   : > { %p1275_p2 = pnand %p1274_p1, %p1518_p10 }
 0x3e8   : > { %p1280_p4 = por %p1279_p13, %p1278_p3 }
 0x3e9   : > { %p1276_p7 = pneg %p1275_p2 }
 0x3ea   : > { %p1282_p8 = por %p1281_p6, %p1280_p4 }
 0x3ec   : > { %p1283_p12 = pnand %p1282_p8, %p1276_p7 }
 0x3ee   : > { %1286 = shalt.err (!%p1283_p12)
}
 0x3ef   : > { %1125 = dma.vmem_to_hbm [thread:$0]  (%p1518_p10), %s856_s17, 128, %s1650_s7, %s823_s14  }
 0x3f0   : > { %s1081_s15 = sshll.u32 %s1369_s24, 6  ;;  %s872_s12 = sshll.u32 %s1638_s30, 4  ;;  %s873_s12 = int_to_ptr.vmem [resolvable:$true] %s872_s12 }
 0x3f1   : > { %s1675_s27 = scalar_lea.hbm %s1727_s5, %s1081_s15  ;;  %s835_s11 = scalar_lea.sflag [#allocation9], %s1571_s1 }
 0x3f2   : > { %s1287_s10 = scalar_lea.vmem %s873_s12, 64  ;;  %s1386_s29 = smov [#allocation8]  }
 0x3f3   : > { %p1288_p11 = scmp.ne.s32.totalorder %s873_s12, %s1287_s10  ;;  %s1291_s28 = sshll.u32 %s1386_s29, 4  ;;  %s1292_s28 = int_to_ptr.vmem [resolvable:$false] %s1291_s28 }
 0x3f4   : > { %s1293_s0 = scalar_lea.vmem %s1292_s28, 128  ;;  %p1294_p9 = scmp.lt.s32.totalorder %s873_s12, %s1292_s28 }
 0x3f5   : > { %p1289_p0 = pnand %p1288_p11, %p1518_p10  ;;  %p1295_p1 = scmp.lt.s32.totalorder %s1293_s0, %s1287_s10 }
 0x3f7   : > { %p1290_p5 = pneg %p1289_p0  ;;  %p1296_p2 = por %p1295_p1, %p1294_p9 }
 0x3f9   : > { %p1297_p7 = pnand %p1296_p2, %p1290_p5 }
 0x3fb   : > { %1300 = shalt.err (!%p1297_p7)
}
 0x3fc   : > { %s1301_s24 = scalar_lea.hbm %s1675_s27, 64  ;;  %s1305_s17 = scalar_lea.hbm %s1727_s5, 128 }
 0x3fd   : > { %p1302_p3 = scmp.ne.s32.totalorder %s1675_s27, %s1301_s24  ;;  %p1306_p6 = scmp.lt.u32.totalorder %s1675_s27, %s1727_s5 }
 0x3fe   : > { %p1307_p8 = scmp.lt.u32.totalorder %s1305_s17, %s1301_s24  ;;  %p1309_p11 = scmp.lt.u32.totalorder %s1301_s24, %s1675_s27 }
 0x3ff   : > { %p1303_p13 = pnand %p1302_p3, %p1518_p10 }
 0x400   : > { %p1308_p12 = por %p1307_p8, %p1306_p6 }
 0x401   : > { %p1304_p4 = pneg %p1303_p13 }
 0x402   : > { %p1310_p0 = por %p1309_p11, %p1308_p12 }
 0x404   : > { %p1311_p5 = pnand %p1310_p0, %p1304_p4 }
 0x406   : > { %1314 = shalt.err (!%p1311_p5)
}
 0x407   : > { %1126 = dma.vmem_to_hbm [thread:$0]  (%p1518_p10), %s873_s12, 64, %s1675_s27, %s835_s11   ;;  %vm820_vm0 = vcmask 0  }
 0x408   : > { %s345_s16 = scalar_lea.vmem %s1728_s6, %s1614_s9 }
 0x46f   : > { %v811_v25 = vpop.xlane.xlu0 %810 }
 0x470   : > { %v812_v17 = vrot.slane %v811_v25, 4 }
 0x472   : > { %v813_v18 = vadd.f32 %v812_v17, %v811_v25 }
 0x474   : > { %v814_v19 = vrot.slane %v813_v18, 2 }
 0x476   : > { %v815_v20 = vadd.f32 %v814_v19, %v813_v18 }
 0x478   : > { %v816_v21 = vrot.slane %v815_v20, 1 }
 0x47a   : > { %v817_v22 = vadd.f32 %v816_v21, %v815_v20 }
 0x47c   : > { %1117 = vpush %v817_v22 }
 0x4ad   : > { %s1118_s19 = spop %1117 }
 0x4ae   : > { %v819_v23 = vstv %s1118_s19 }
 0x4af   : > { %821 = vst.msk [vmem:[%s345_s16] sm:$0x1] %vm820_vm0, %v819_v23 }
 0x4b0 PF: > { %s887_s18 = sand.u32 1, %s1357_s21   ;;  %p1750_p10 = scmp.ne.s32.totalorder %s1738_s8, 0 }
 0x4b1   : > { %p1751_p9 = scmp.ge.s32.totalorder %s1377_s26, 2  ;;  %s888_s12 = scalar_lea.sflag [#allocation4], %s887_s18 }
 0x4b3   : > { %p1138_p1 = pnand %p1751_p9, %p1750_p10 }
 0x4b5   : > { %1348 = dma.done.wait (!%p1138_p1), %s888_s12, 128  }
 0x4b6   : > { %1350 = vsyncadd (!%p1138_p1), %s888_s12, 4294967168  ;;  %s907_s27 = scalar_lea.sflag [#allocation9], %s887_s18 }
 0x4b7   : > { %1352 = dma.done.wait (!%p1138_p1), %s907_s27, 64  }
 0x4b8   : > { %1354 = vsyncadd (!%p1138_p1), %s907_s27, 4294967232  ;;  %s27_s26 = sadd.s32 1, %s1377_s26   ;;  %s1752_s21 = smov %s1361_s22 }
 0x4b9   : > { %p24_p2 = scmp.ge.s32.totalorder %s27_s26, 4   ;;  %s1753_s22 = smov %s1365_s23 }
 0x4ba   : > { %s1754_s23 = smov %s1527_s20  ;;  %s1755_s24 = smov %s1373_s25 }
 0x4bb   : > { %s1756_s25 = smov %s1758_s13  ;;  %26 = sbr.rel (!%p24_p2) target bundleno = 12 (0xc), region = 122 }
 0x4c2   :  { %921 = vsyncpa [#allocation3], 1 }
 0x4c3   :  { %923 = vsyncpa [#allocation3 + $0x1], 1 }
 0x4c4   :  { %924 = vsyncpa [#allocation6], 1 }
 0x4c5   :  { %925 = vsyncpa [#allocation4], 1 }
 0x4c6   :  { %927 = vsyncpa [#allocation4 + $0x1], 1 }
 0x4c7   :  { %928 = vsyncpa [#allocation9], 1 }
 0x4c8   :  { %930 = vsyncpa [#allocation9 + $0x1], 1 }

</bundles_post_ra>
